<compile_context>
chip_gen: v5e
topology: v5e:2x2
jax: 0.10.0
libtpu: 0.0.40
codegen_flags: <defaults>
</compile_context>

<pallas_src>
import functools

import jax
import jax.numpy as jnp
from jax.experimental import pallas as pl
from jax.experimental.pallas import tpu as pltpu


def _round_up(x, m):
    return ((x + m - 1) // m) * m


def ik_actor_kernel(state_ref, w_ref, mu_ref):
    # Single fused matmul: mu = state @ W  (scale / error-pose / pinv step pre-folded into W).
    mu_ref[...] = jnp.dot(
        state_ref[...], w_ref[...], preferred_element_type=jnp.float32
    ).astype(mu_ref.dtype)


def build_ik_weights(screws):
    """Precompute the fused weight matrix W once (hoists the pinv/SVD off the call path).

    screws: [n_dof, 6] f32 ->  W: [6 + n_dof, n_dof] f32 with
        mu = state @ W == -0.01 * ((thetas @ screws - target_pose) @ pinv(screws.T).T)
    """
    jacobian = screws.T                                    # [6, n_dof]
    jpinv_t = jnp.linalg.pinv(jacobian).T                  # [6, n_dof]
    w_target = 0.01 * jpinv_t                              # rows multiplying target_pose
    w_thetas = -0.01 * (screws @ jpinv_t)                  # rows multiplying thetas
    return jnp.concatenate([w_target, w_thetas], axis=0)   # [6 + n_dof, n_dof]


@functools.partial(jax.jit, static_argnames=("block_b",))
def pseudoinv_jacobian_ik_actor(state, w, *, block_b=1024):
    """state: [B, 6 + n_dof] f32; w: [6 + n_dof, n_dof] f32 (from build_ik_weights).

    Returns (mu, var), each [B, n_dof] f32.
    """
    B, state_dim = state.shape
    n_dof = w.shape[1]
    assert w.shape[0] == state_dim

    # Batch tile: multiple of 8 sublanes, capped so double-buffered tiles stay tiny
    # (2 * TB * (state_dim + n_dof) * 4 bytes << 32 MiB scoped VMEM on all generations).
    tb = min(_round_up(block_b, 8), _round_up(B, 8))
    padded_b = _round_up(B, tb)
    if padded_b != B:
        state = jnp.pad(state, ((0, padded_b - B), (0, 0)))

    mu = pl.pallas_call(
        ik_actor_kernel,
        out_shape=jax.ShapeDtypeStruct((padded_b, n_dof), jnp.float32),
        grid=(padded_b // tb,),
        in_specs=[
            pl.BlockSpec((tb, state_dim), lambda i: (i, 0)),       # batch-tiled state
            pl.BlockSpec((state_dim, n_dof), lambda i: (0, 0)),    # weight: constant block, stays resident
        ],
        out_specs=pl.BlockSpec((tb, n_dof), lambda i: (i, 0)),
        compiler_params=pltpu.CompilerParams(
            dimension_semantics=("parallel",),
        ),
    )(state, w)

    mu = mu[:B]
    var = jnp.zeros_like(mu)   # produced by XLA, not written from the kernel
    return mu, var


def _reference(state, screws):
    target_pose = state[:, :6]
    thetas = state[:, 6:]
    cur_pose = thetas @ screws
    error_pose = cur_pose - target_pose
    jpinv = jnp.linalg.pinv(screws.T)        # [n_dof, 6]
    mu = -0.01 * (error_pose @ jpinv.T)
    var = jnp.zeros_like(mu)
    return mu, var


if __name__ == "__main__":
    n_dof = 8

    key = jax.random.PRNGKey(0)
    k_state, k_screws, k_state2, k_state3 = jax.random.split(key, 4)

    # Deterministic synthetic "open chain" parameters: screw axes [n_dof, 6].
    screws = jax.random.normal(k_screws, (n_dof, 6), dtype=jnp.float32)

    # Fused weight matrix computed once (SVD hoisted off the per-call path).
    w = build_ik_weights(screws)

    # Case 1: small aligned batch.
    B = 8
    state = jax.random.normal(k_state, (B, 6 + n_dof), dtype=jnp.float32)
    mu, var = pseudoinv_jacobian_ik_actor(state, w)
    jax.block_until_ready((mu, var))
    mu_ref, var_ref = _reference(state, screws)
    assert mu.shape == (B, n_dof) and var.shape == (B, n_dof)
    assert jnp.allclose(mu, mu_ref, atol=1e-4, rtol=1e-4)
    assert jnp.allclose(var, var_ref)

    # Case 2: batch not a multiple of 8 (exercises the padding path).
    B2 = 20
    state2 = jax.random.normal(k_state2, (B2, 6 + n_dof), dtype=jnp.float32)
    mu2, var2 = pseudoinv_jacobian_ik_actor(state2, w)
    jax.block_until_ready((mu2, var2))
    mu2_ref, var2_ref = _reference(state2, screws)
    assert mu2.shape == (B2, n_dof) and var2.shape == (B2, n_dof)
    assert jnp.allclose(mu2, mu2_ref, atol=1e-4, rtol=1e-4)
    assert jnp.allclose(var2, var2_ref)

    # Case 3: batch larger than one tile (exercises the multi-step pipelined grid).
    B3 = 3000
    state3 = jax.random.normal(k_state3, (B3, 6 + n_dof), dtype=jnp.float32)
    mu3, var3 = pseudoinv_jacobian_ik_actor(state3, w)
    jax.block_until_ready((mu3, var3))
    mu3_ref, var3_ref = _reference(state3, screws)
    assert mu3.shape == (B3, n_dof) and var3.shape == (B3, n_dof)
    assert jnp.allclose(mu3, mu3_ref, atol=1e-4, rtol=1e-4)
    assert jnp.allclose(var3, var3_ref)

    print("KERNEL_OK")
</pallas_src>

<mosaic_0001>
module attributes {stable_mosaic.version = 11 : i64} {
  func.func @ik_actor_kernel(%arg0: i32, %arg1: memref<8x14xf32, #tpu.memory_space<vmem>>, %arg2: memref<14x8xf32, #tpu.memory_space<vmem>>, %arg3: memref<8x8xf32, #tpu.memory_space<vmem>>) attributes {dimension_semantics = [#tpu.dimension_semantics<parallel>], iteration_bounds = array<i64: 1>, scalar_prefetch = 0 : i64, scratch_operands = 0 : i64, tpu.core_type = #tpu.core_type<tc>, window_params = [{transform_indices = @transform_0, window_bounds = array<i64: 8, 14>}, {pipeline_mode = #tpu.pipeline_mode<synchronous>, transform_indices = @transform_1, window_bounds = array<i64: 14, 8>}, {transform_indices = @transform_2, window_bounds = array<i64: 8, 8>}]} {
    %c0 = arith.constant 0 : index
    %c0_0 = arith.constant 0 : index
    %0 = vector.load %arg1[%c0, %c0_0] : memref<8x14xf32, #tpu.memory_space<vmem>>, vector<8x14xf32>
    %c0_1 = arith.constant 0 : index
    %c0_2 = arith.constant 0 : index
    %1 = vector.load %arg2[%c0_1, %c0_2] : memref<14x8xf32, #tpu.memory_space<vmem>>, vector<14x8xf32>
    %cst = arith.constant dense<0.000000e+00> : vector<8x8xf32>
    %2 = tpu.matmul %0, %1, %cst {dimension_numbers = #tpu.dot_dimension_numbers<[1], [0], [0], [1], [0, 0, 1, 1], [], []>} : vector<8x14xf32>, vector<14x8xf32>, vector<8x8xf32> -> vector<8x8xf32>
    %c0_3 = arith.constant 0 : index
    %c0_4 = arith.constant 0 : index
    %3 = vector.load %arg3[%c0_3, %c0_4] : memref<8x8xf32, #tpu.memory_space<vmem>>, vector<8x8xf32>
    tpu.vector_store %arg3[%c0_3, %c0_4], %2 {strides = array<i32>} : memref<8x8xf32, #tpu.memory_space<vmem>>, vector<8x8xf32>,
    return
  }
  func.func @transform_0(%arg0: i32) -> (i32, i32) {
    %c0_i32 = arith.constant 0 : i32
    %c0_i32_0 = arith.constant 0 : i32
    return %arg0, %c0_i32 : i32, i32
  }
  func.func @transform_1(%arg0: i32) -> (i32, i32) {
    %c0_i32 = arith.constant 0 : i32
    %c0_i32_0 = arith.constant 0 : i32
    %c0_i32_1 = arith.constant 0 : i32
    return %c0_i32, %c0_i32_0 : i32, i32
  }
  func.func @transform_2(%arg0: i32) -> (i32, i32) {
    %c0_i32 = arith.constant 0 : i32
    %c0_i32_0 = arith.constant 0 : i32
    return %arg0, %c0_i32 : i32, i32
  }
}

</mosaic_0001>

<bundles_post_ra>
// kernel: pseudoinv_jacobian_ik_actor.1
= control target key start
LH: loop header
LB: loop body
LE: loop exit
PB: predicated region body
PF: predicated region fallthrough
CT: control target
= control target key end

     0   :  { %vm19_vm0 = vcmask 1045504   ;;  %vm15_vm1 = vcmask 113664   ;;  %s118_s0 = inlined_call_operand.vmem [shape: f32[8,14], index: 0, kind: input, shape index: {}]   ;;  %s119_s1 = inlined_call_operand.vmem [shape: f32[14,8], index: 1, kind: input, shape index: {}]   ;;  %s120_s2 = inlined_call_operand.hbm [shape: f32[8,8], index: 2, kind: output, shape index: {}]  }
   0x1   :  { %v14_v0 = vld [vmem:[%s119_s1 + $0x8] sm:$0x3f]  ;;  %v13_v1 = vld [vmem:[%s119_s1] sm:$0xff] }
   0x2   :  { %61 = vmatpush.msk.msra.mxu0 %vm19_vm0, %v14_v0  ;;  %v12_v2 = vld [vmem:[%s118_s0] sm:$0xff] }
   0x3   :  { %7 = vsyncpa [#allocation3], 0  ;;  %s90_s15 = smov [#allocation2]   ;;  %s52_s19 = sshll.u32 %s120_s2, 4  ;;  %vm43_vm2 = vcmask 64512   ;;  %s53_s19 = int_to_ptr.hbm [resolvable:$true] %s52_s19 }
   0x4   :  { %38 = vmatpush.msra.mxu0 %v13_v1  ;;  %s50_s16 = sshll.u32 %s90_s15, 4  ;;  %s51_s16 = int_to_ptr.vmem [resolvable:$true] %s50_s16 }
   0x5   :  { %62 = vmatmul.msk.f32.vlgmr.msra.gmra.mxu0 %vm15_vm1, %v12_v2 }
  0x82   :  { %v40_v3 = vpop.f32.mrf.mxu0 }
  0x83   :  { %44 = vst.msk [vmem:[#allocation2] sm:$0xff] %vm43_vm2, %v40_v3 }
  0x84   :  { %55 = dma.vmem_to_hbm [thread:$0]  %s51_s16, 128, %s53_s19, [#allocation3]  }
  0x85   :  { %88 = dma.done.wait [#allocation3], 128  }
  0x86   :  { %89 = vsyncadd [#allocation3], 4294967168 }
  0x87   :  { %60 = vsyncpa [#allocation3], 1 }

</bundles_post_ra>
